<compile_context>
chip_gen: v6e
topology: v6e:2x2x1
jax: 0.10.0
libtpu: 0.0.40
codegen_flags: <defaults>
</compile_context>

<pallas_src>
import math
import functools

import jax
import jax.numpy as jnp
from jax.experimental import pallas as pl
from jax.experimental.pallas import tpu as pltpu


_SQRT_2_OVER_PI = math.sqrt(2.0 / math.pi)
_BN_EPS = 1e-5
_LANE = 128
_ROW = 16                     # row alignment (satisfies bf16 (16,128) packing)


def _device_cfg():
    """Per-generation row-tile cap and VMEM limit."""
    try:
        kind = jax.devices()[0].device_kind.lower()
    except Exception:
        kind = ""
    if ("v4" in kind) or ("v5" in kind) or ("v6" in kind):
        # 128 MiB VMEM parts: bigger row tiles move these mem-bound kernels to roofline.
        return 512, 100 * 1024 * 1024
    # v7x (64 MiB VMEM / TC) and unknown: conservative.
    return 256, 48 * 1024 * 1024


_MAX_TM, _VMEM_LIMIT = _device_cfg()


def _gelu(x):
    # tanh-approximation GELU (matches the repo's custom GELU module)
    return 0.5 * x * (1.0 + jnp.tanh(_SQRT_2_OVER_PI * (x + 0.044715 * x ** 3)))


def _apply_act(y, act):
    if act == "relu":
        return jnp.maximum(y, 0.0)
    if act == "gelu":
        return _gelu(y)
    return y


def _rup(v, m):
    return ((v + m - 1) // m) * m


def _cdiv(a, b):
    return -(-a // b)


def _row_cfg(m, max_tm=None):
    """Pick (padded rows, row tile) minimizing pad waste; force >=2 grid steps when
    possible so dimension_semantics=("parallel",) can shard across v7x's two TCs."""
    if max_tm is None:
        max_tm = _MAX_TM
    mp0 = _rup(max(m, _ROW), _ROW)
    nt = max(_cdiv(mp0, max_tm), 1)
    if mp0 >= 2 * _ROW:
        nt = max(nt, 2)
    tm = _rup(_cdiv(mp0, nt), _ROW)
    mp = _rup(mp0, tm)
    return mp, tm


def _cp():
    # TODO(synk): on v7x, single-buffer the grid-invariant weight operands
    # (pipeline_mode=pl.Buffered(1)) to free VMEM for larger row tiles; kept default
    # double-buffering here for portability across JAX/libtpu versions.
    return pltpu.CompilerParams(dimension_semantics=("parallel",),
                                vmem_limit_bytes=_VMEM_LIMIT)


# ----------------------------- Pallas kernels -----------------------------

def _linear_kernel(x_ref, w_ref, b_ref, o_ref, *, act, pre_relu):
    x = x_ref[...]
    if pre_relu:
        x = jnp.maximum(x, 0.0)
    x = x.astype(jnp.bfloat16)
    y = jnp.dot(x, w_ref[...], preferred_element_type=jnp.float32) + b_ref[...]
    o_ref[...] = _apply_act(y, act).astype(o_ref.dtype)


def pallas_linear(xp, wp, bp, *, tm, act="none", pre_relu=False, out_dtype=jnp.float32):
    """y = act(relu?(x) @ wp + bp); all operands pre-padded, weights VMEM-resident."""
    Mp, Kp = xp.shape
    Np = wp.shape[1]
    return pl.pallas_call(
        functools.partial(_linear_kernel, act=act, pre_relu=pre_relu),
        out_shape=jax.ShapeDtypeStruct((Mp, Np), out_dtype),
        grid=(Mp // tm,),
        in_specs=[
            pl.BlockSpec((tm, Kp), lambda i: (i, 0)),
            pl.BlockSpec((Kp, Np), lambda i: (0, 0)),
            pl.BlockSpec((1, Np), lambda i: (0, 0)),
        ],
        out_specs=pl.BlockSpec((tm, Np), lambda i: (i, 0)),
        compiler_params=_cp(),
    )(xp, wp, bp)


def _mlp2_kernel(x_ref, w1_ref, b1_ref, w2_ref, b2_ref, o_ref, *, act):
    h = (jnp.dot(x_ref[...].astype(jnp.bfloat16), w1_ref[...],
                 preferred_element_type=jnp.float32) + b1_ref[...])
    h = jnp.maximum(h, 0.0).astype(jnp.bfloat16)          # ReLU, stays in VMEM
    y = jnp.dot(h, w2_ref[...], preferred_element_type=jnp.float32) + b2_ref[...]
    o_ref[...] = _apply_act(y, act).astype(o_ref.dtype)


def pallas_mlp2(xp, w1p, b1p, w2p, b2p, *, tm, act="none"):
    """Fused Linear -> (folded BN) -> ReLU -> Linear (-> act); no HBM intermediate."""
    Mp, Kp = xp.shape
    Hd = w1p.shape[1]
    Np = w2p.shape[1]
    return pl.pallas_call(
        functools.partial(_mlp2_kernel, act=act),
        out_shape=jax.ShapeDtypeStruct((Mp, Np), jnp.float32),
        grid=(Mp // tm,),
        in_specs=[
            pl.BlockSpec((tm, Kp), lambda i: (i, 0)),
            pl.BlockSpec((Kp, Hd), lambda i: (0, 0)),
            pl.BlockSpec((1, Hd), lambda i: (0, 0)),
            pl.BlockSpec((Hd, Np), lambda i: (0, 0)),
            pl.BlockSpec((1, Np), lambda i: (0, 0)),
        ],
        out_specs=pl.BlockSpec((tm, Np), lambda i: (i, 0)),
        compiler_params=_cp(),
    )(xp, w1p, b1p, w2p, b2p)


def _node_proj_kernel(x_ref, n_ref, wx_ref, wn_ref, b_ref, k_ref, mq_ref, *, dp):
    # y = [_X | nfe] @ [Wk_x | Wm_x | Wq] + [bk | bm | bq]  (K|M|Q merged along N)
    y = (jnp.dot(x_ref[...].astype(jnp.bfloat16), wx_ref[...],
                 preferred_element_type=jnp.float32)
         + jnp.dot(n_ref[...], wn_ref[...], preferred_element_type=jnp.float32)
         + b_ref[...])
    k_ref[...] = y[:, :dp].astype(jnp.bfloat16)
    mq_ref[...] = y[:, dp:].astype(jnp.bfloat16)


def pallas_node_proj(xp, nfp, wx1, wx2, bias, *, tm, dp):
    """Node-space K/M/Q projections (computed per node, gathered per edge later)."""
    Mp = xp.shape[0]
    return pl.pallas_call(
        functools.partial(_node_proj_kernel, dp=dp),
        out_shape=(jax.ShapeDtypeStruct((Mp, dp), jnp.bfloat16),
                   jax.ShapeDtypeStruct((Mp, 2 * dp), jnp.bfloat16)),
        grid=(Mp // tm,),
        in_specs=[
            pl.BlockSpec((tm, dp), lambda i: (i, 0)),
            pl.BlockSpec((tm, dp), lambda i: (i, 0)),
            pl.BlockSpec((dp, 3 * dp), lambda i: (0, 0)),
            pl.BlockSpec((dp, 3 * dp), lambda i: (0, 0)),
            pl.BlockSpec((1, 3 * dp), lambda i: (0, 0)),
        ],
        out_specs=(pl.BlockSpec((tm, dp), lambda i: (i, 0)),
                   pl.BlockSpec((tm, 2 * dp), lambda i: (i, 0))),
        compiler_params=_cp(),
    )(xp, nfp, wx1, wx2, bias)


def _edge_msg_kernel(kg_ref, mq_ref, ee_ref, we_ref, hoh_ref, score_ref, msg_ref, *, dp):
    # edge_emb pushed through the merged [Dp, 2Dp] (Wk_e | Wm_e) weight exactly once
    eproj = jnp.dot(ee_ref[...], we_ref[...], preferred_element_type=jnp.float32)
    mq = mq_ref[...].astype(jnp.float32)
    key = kg_ref[...].astype(jnp.float32) + eproj[:, :dp]
    msg = mq[:, :dp] + eproj[:, dp:]
    qk = (mq[:, dp:] * key).astype(jnp.bfloat16)          # query already scaled/biased
    # per-head sum of q*k on the MXU -> lane-dense 128-wide score (no XLU reduce)
    score_ref[...] = jnp.dot(qk, hoh_ref[...], preferred_element_type=jnp.float32)
    # TODO(synk): on v5e, emit msg as bf16 to halve the [Eall, D] writeback (store-slot
    # / HBM-write bound there); kept f32 to stay closer to the f32 reference numerics.
    msg_ref[...] = msg


def pallas_edge_message(kg, mqg, ee, we, hoh, *, tm, dp):
    """Fused GATConvE.message edge stage: key/msg = gathered node proj + edge proj,
    plus scaled per-head q*k attention scores."""
    Ep = kg.shape[0]
    return pl.pallas_call(
        functools.partial(_edge_msg_kernel, dp=dp),
        out_shape=(jax.ShapeDtypeStruct((Ep, _LANE), jnp.float32),
                   jax.ShapeDtypeStruct((Ep, dp), jnp.float32)),
        grid=(Ep // tm,),
        in_specs=[
            pl.BlockSpec((tm, dp), lambda i: (i, 0)),
            pl.BlockSpec((tm, 2 * dp), lambda i: (i, 0)),
            pl.BlockSpec((tm, dp), lambda i: (i, 0)),
            pl.BlockSpec((dp, 2 * dp), lambda i: (0, 0)),
            pl.BlockSpec((dp, _LANE), lambda i: (0, 0)),
        ],
        out_specs=(pl.BlockSpec((tm, _LANE), lambda i: (i, 0)),
                   pl.BlockSpec((tm, dp), lambda i: (i, 0))),
        compiler_params=_cp(),
    )(kg, mqg, ee, we, hoh)


def _dual_linear_gelu_kernel(h_ref, x_ref, wh_ref, bh_ref, wx_ref, bx_ref, o_ref):
    y = (jnp.dot(h_ref[...].astype(jnp.bfloat16), wh_ref[...],
                 preferred_element_type=jnp.float32) + bh_ref[...]
         + jnp.dot(x_ref[...].astype(jnp.bfloat16), wx_ref[...],
                   preferred_element_type=jnp.float32) + bx_ref[...])
    o_ref[...] = _gelu(y)


def pallas_dual_linear_gelu(hp, xp, wh, bh, wx, bx, *, tm):
    """gelu(H @ Vh + bh + X @ Vx + bx) — the final fusion."""
    Mp, K1p = hp.shape
    K2p = xp.shape[1]
    Np = wh.shape[1]
    return pl.pallas_call(
        _dual_linear_gelu_kernel,
        out_shape=jax.ShapeDtypeStruct((Mp, Np), jnp.float32),
        grid=(Mp // tm,),
        in_specs=[
            pl.BlockSpec((tm, K1p), lambda i: (i, 0)),
            pl.BlockSpec((tm, K2p), lambda i: (i, 0)),
            pl.BlockSpec((K1p, Np), lambda i: (0, 0)),
            pl.BlockSpec((1, Np), lambda i: (0, 0)),
            pl.BlockSpec((K2p, Np), lambda i: (0, 0)),
            pl.BlockSpec((1, Np), lambda i: (0, 0)),
        ],
        out_specs=pl.BlockSpec((tm, Np), lambda i: (i, 0)),
        compiler_params=_cp(),
    )(hp, xp, wh, bh, wx, bx)


# ----------------------------- parameters -----------------------------

def init_linear(key, fan_in, fan_out):
    k1, k2 = jax.random.split(key)
    bound = 1.0 / math.sqrt(fan_in)
    w = jax.random.uniform(k1, (fan_in, fan_out), jnp.float32, -bound, bound)
    b = jax.random.uniform(k2, (fan_out,), jnp.float32, -bound, bound)
    return w, b


def fold_bn_eval(w, b):
    # eval-mode BatchNorm1d with fresh running stats: y = x / sqrt(1 + eps)
    s = 1.0 / math.sqrt(1.0 + _BN_EPS)
    return w * s, b * s


def init_params(seed, k, n_ntype, n_etype, hidden):
    key = jax.random.PRNGKey(seed + 1234)
    it = iter(jax.random.split(key, 16 + 8 * k))
    p = {}
    p["emb_node_type"] = init_linear(next(it), n_ntype, hidden // 2)
    p["emb_score"] = init_linear(next(it), hidden // 2, hidden // 2)
    p["edge_enc_l1"] = init_linear(next(it), n_etype + 1 + 2 * n_ntype, hidden)
    p["edge_enc_l2"] = init_linear(next(it), hidden, hidden)
    p["gnn"] = []
    for _ in range(k):
        p["gnn"].append(dict(
            key=init_linear(next(it), 3 * hidden, hidden),
            msg=init_linear(next(it), 3 * hidden, hidden),
            query=init_linear(next(it), 2 * hidden, hidden),
            mlp1=init_linear(next(it), hidden, hidden),
            mlp2=init_linear(next(it), hidden, hidden),
        ))
    p["Vh"] = init_linear(next(it), hidden, hidden)
    p["Vx"] = init_linear(next(it), hidden, hidden)
    return p


def _prep_w(w, kp, np_):
    k, n = w.shape
    return jnp.pad(w.astype(jnp.float32), ((0, kp - k), (0, np_ - n))).astype(jnp.bfloat16)


def _prep_b(b, np_):
    n = b.shape[0]
    return jnp.pad(b.astype(jnp.float32), (0, np_ - n)).reshape(1, np_)


def prepare_params(p, n_ntype, n_etype, hidden, head_count):
    """Pad / cast / split / merge / fold all weights ONCE (outside the forward pass)."""
    D = hidden
    Dh = D // 2
    Dp = _rup(max(D, _LANE), _LANE)
    Dhp = _rup(max(Dh, _LANE), _LANE)
    dph = D // head_count
    inv_sqrt = 1.0 / math.sqrt(dph)

    prep = {"D": D, "Dp": Dp, "Dhp": Dhp, "dph": dph, "head_count": head_count,
            "n_ntype": n_ntype, "n_etype": n_etype}

    # emb_node_type input is a one-hot -> implemented as a weight-row gather (no matmul).
    w_nt, b_nt = p["emb_node_type"]
    prep["emb_node_type"] = (w_nt.astype(jnp.float32), b_nt.astype(jnp.float32))

    w_s, b_s = p["emb_score"]
    prep["emb_score"] = (_prep_w(w_s, Dhp, Dhp), _prep_b(b_s, Dhp))

    # edge_encoder layer1 (eval-BN folded), kept unpadded f32 for row gathers
    w1, b1 = fold_bn_eval(*p["edge_enc_l1"])
    prep["edge_w1"] = w1.astype(jnp.float32)
    prep["edge_b1"] = b1.astype(jnp.float32)
    w2, b2 = p["edge_enc_l2"]
    prep["edge_l2"] = (_prep_w(w2, Dp, Dp), _prep_b(b2, Dp))

    layers = []
    for lp in p["gnn"]:
        wk, bk = lp["key"]
        wm, bm = lp["msg"]
        wq, bq = lp["query"]
        wq = wq * inv_sqrt                     # fold 1/sqrt(dim_per_head) into query
        bq = bq * inv_sqrt
        # node-space halves (_X rows 0:D, nfe rows D:2D), K|M|Q merged along columns
        wx1 = jnp.concatenate([_prep_w(wk[:D], Dp, Dp), _prep_w(wm[:D], Dp, Dp),
                               _prep_w(wq[:D], Dp, Dp)], axis=1)          # [Dp, 3Dp]
        wx2 = jnp.concatenate([_prep_w(wk[D:2 * D], Dp, Dp), _prep_w(wm[D:2 * D], Dp, Dp),
                               _prep_w(wq[D:2 * D], Dp, Dp)], axis=1)     # [Dp, 3Dp]
        b_kmq = jnp.concatenate([_prep_b(bk, Dp), _prep_b(bm, Dp), _prep_b(bq, Dp)],
                                axis=1)                                    # [1, 3Dp]
        # edge-feature halves, key|msg merged so edge_emb is read by the MXU once
        we = jnp.concatenate([_prep_w(wk[2 * D:], Dp, Dp), _prep_w(wm[2 * D:], Dp, Dp)],
                             axis=1)                                       # [Dp, 2Dp]
        w_m1, b_m1 = fold_bn_eval(*lp["mlp1"])
        w_m2, b_m2 = lp["mlp2"]
        layers.append(dict(
            wx1=wx1, wx2=wx2, b_kmq=b_kmq, we=we,
            mlp1=(_prep_w(w_m1, Dp, Dp), _prep_b(b_m1, Dp)),
            mlp2=(_prep_w(w_m2, Dp, Dp), _prep_b(b_m2, Dp)),
        ))
    prep["gnn"] = layers

    wh, bh = p["Vh"]
    wx, bx = p["Vx"]
    prep["Vh"] = (_prep_w(wh, Dp, Dp), _prep_b(bh, Dp))
    prep["Vx"] = (_prep_w(wx, Dp, Dp), _prep_b(bx, Dp))

    # constant one-hot [Dp, 128] summing q*k per head on the MXU (bf16: 0/1 exact);
    # mask keeps padded feature lanes out of the scores.
    d_idx = jnp.arange(Dp)
    h_idx = jnp.arange(_LANE)
    hoh = ((d_idx[:, None] // dph) == h_idx[None, :]) & (d_idx[:, None] < D)
    prep["head_onehot"] = hoh.astype(jnp.bfloat16)
    return prep


# ----------------------------- model forward -----------------------------

def qagnn_message_passing_forward(prep, H, A, node_type, node_score):
    edge_index, edge_type = A
    Bsz, Nn_per, D = H.shape
    head_count = prep["head_count"]
    dph = prep["dph"]
    Dp = prep["Dp"]
    Dhp = prep["Dhp"]
    Dh = D // 2
    n_ntype = prep["n_ntype"]
    n_etype = prep["n_etype"]

    nt_flat = node_type.reshape(-1)
    Nn = nt_flat.shape[0]
    Nnp, tmn = _row_cfg(Nn)

    # node-type embedding: one-hot @ W == row gather of W, then GELU
    w_nt, b_nt = prep["emb_node_type"]
    node_type_emb = _gelu(w_nt[nt_flat] + b_nt[None, :])                 # [Nn, D/2]

    # node-score embedding (sin basis -> Linear -> GELU)
    js = jnp.power(1.1, jnp.arange(Dh, dtype=jnp.float32))[None, None, :]
    Bmat = jnp.sin(js * node_score).reshape(-1, Dh)                      # [Nn, D/2]
    Bp = jnp.pad(Bmat, ((0, Nnp - Nn), (0, Dhp - Dh)))
    node_score_emb = pallas_linear(Bp, *prep["emb_score"], tm=tmn, act="gelu")[:Nn, :Dh]

    nfe = jnp.concatenate([node_type_emb, node_score_emb], axis=1)       # [Nn, D]
    nfe_p = jnp.pad(nfe, ((0, Nnp - Nn), (0, Dp - D))).astype(jnp.bfloat16)

    # self-loop-augmented edge index; pad index arrays once to the tile-aligned length
    loop_index = jnp.arange(Nn, dtype=edge_index.dtype)
    src = jnp.concatenate([edge_index[0], loop_index])
    tgt = jnp.concatenate([edge_index[1], loop_index])
    ei = jnp.stack([src, tgt])
    Eall = src.shape[0]
    Ep, tme = _row_cfg(Eall)
    src_g = jnp.pad(src, (0, Ep - Eall))          # pad edges point at node 0 ...
    tgt_g = jnp.pad(tgt, (0, Ep - Eall))
    valid_e = jnp.arange(Ep) < Eall               # ... but are masked to alpha == 0

    # edge encoder (hoisted out of the layer loop: depends only on edge/node types).
    # First layer (one-hot input) == sum of three weight rows + bias; ReLU + second
    # Linear run fused in one Pallas kernel; output stays padded+bf16 for all layers.
    head_t = nt_flat[edge_index[0]]
    tail_t = nt_flat[edge_index[1]]
    w1, b1 = prep["edge_w1"], prep["edge_b1"]
    off_h = n_etype + 1
    off_t = n_etype + 1 + n_ntype
    pre_real = w1[edge_type] + w1[off_h + head_t] + w1[off_t + tail_t] + b1[None, :]
    pre_self = (w1[n_etype][None, :] + w1[off_h + nt_flat] + w1[off_t + nt_flat]
                + b1[None, :])
    pre = jnp.concatenate([pre_real, pre_self], axis=0)                  # [Eall, D]
    pre_p = jnp.pad(pre, ((0, Ep - Eall), (0, Dp - D)))
    edge_emb_p = pallas_linear(pre_p, *prep["edge_l2"], tm=tme,
                               pre_relu=True, out_dtype=jnp.bfloat16)    # [Ep, Dp] bf16

    counts = jax.ops.segment_sum(jnp.where(valid_e, 1.0, 0.0), src_g, num_segments=Nnp)

    _Xp = jnp.pad(H.reshape(-1, D), ((0, Nnp - Nn), (0, Dp - D)))        # [Nnp, Dp] f32
    Hp = _Xp
    all_gnn_attn, all_edge_map = [], []
    for lp in prep["gnn"]:
        # K/M/Q projections in node space (Nn rows instead of Eall rows of matmul)
        k_tab, mq_tab = pallas_node_proj(_Xp, nfe_p, lp["wx1"], lp["wx2"], lp["b_kmq"],
                                         tm=tmn, dp=Dp)
        kg = k_tab[tgt_g]                     # [Ep, Dp]  bf16, key part  (x_i = target)
        mqg = mq_tab[src_g]                   # [Ep, 2Dp] bf16, msg|query (x_j = source)

        scores_f, msg = pallas_edge_message(kg, mqg, edge_emb_p, lp["we"],
                                            prep["head_onehot"], tm=tme, dp=Dp)
        scores = scores_f[:, :head_count]
        scores = jnp.where(valid_e[:, None], scores, -1e30)   # pad edges -> alpha == 0

        # TODO(synk): segment softmax / scatter-add aggregation are data-dependent
        # gather/scatter ops; kept in plain JAX (jax.ops.segment_*) rather than Pallas.
        seg_max = jax.ops.segment_max(scores, src_g, num_segments=Nnp)
        ex = jnp.exp(scores - seg_max[src_g])
        denom = jax.ops.segment_sum(ex, src_g, num_segments=Nnp)[src_g] + 1e-16
        alpha = ex / denom
        alpha_scaled = alpha * counts[src_g][:, None]

        msg_d = msg if D == Dp else msg[:, :D]
        # TODO(synk): verify XLA fuses this broadcast-mul into the scatter-add; if not,
        # fold alpha into a small Pallas kernel so `weighted` is never materialized.
        weighted = (msg_d.reshape(Ep, head_count, dph)
                    * alpha_scaled[:, :, None]).reshape(Ep, D)
        aggr = jax.ops.segment_sum(weighted, tgt_g, num_segments=Nnp)    # [Nnp, D]
        aggr_p = aggr if D == Dp else jnp.pad(aggr, ((0, 0), (0, Dp - D)))

        # mlp (Linear -> folded eval-BN -> ReLU -> Linear) fused with mp_helper GELU;
        # dropout is identity in eval mode.  Output stays padded for the next layer.
        _Xp = pallas_mlp2(aggr_p, *lp["mlp1"], *lp["mlp2"], tm=tmn, act="gelu")

        all_gnn_attn.append(alpha[:Eall, -1][:500])
        all_edge_map.append(ei[:, :500])

    out_p = pallas_dual_linear_gelu(Hp, _Xp, *prep["Vh"], *prep["Vx"], tm=tmn)
    output = out_p[:Nn, :D].reshape(Bsz, Nn_per, D)
    return output, (all_gnn_attn, all_edge_map)


# ----------------------------- demo -----------------------------

if __name__ == "__main__":
    Bsz, Nn, D = 2, 8, 32          # batch, nodes per graph, hidden size
    n_ntype, n_etype = 4, 3
    k_layers, head_count, E = 2, 4, 24

    key = jax.random.PRNGKey(0)
    k1, k2, k3, k4, k5 = jax.random.split(key, 5)
    H = jax.random.normal(k1, (Bsz, Nn, D), jnp.float32)
    node_type = jax.random.randint(k2, (Bsz, Nn), 0, n_ntype)
    node_score = jax.random.uniform(k3, (Bsz, Nn, 1), jnp.float32)
    edge_index = jax.random.randint(k4, (2, E), 0, Bsz * Nn)   # flattened node indices
    edge_type = jax.random.randint(k5, (E,), 0, n_etype)

    raw_params = init_params(0, k_layers, n_ntype, n_etype, D)
    params = prepare_params(raw_params, n_ntype, n_etype, D, head_count)

    output, (all_attn, all_edge_map) = qagnn_message_passing_forward(
        params, H, (edge_index, edge_type), node_type, node_score)

    jax.block_until_ready(output)
    assert output.shape == (Bsz, Nn, D)
    assert len(all_attn) == k_layers and len(all_edge_map) == k_layers
    assert bool(jnp.all(jnp.isfinite(output)))
    print("KERNEL_OK")
</pallas_src>

<mosaic_0001>
module attributes {stable_mosaic.version = 11 : i64} {
  func.func @_linear_kernel(%arg0: i32, %arg1: memref<16x128xf32, #tpu.memory_space<vmem>>, %arg2: memref<128x128xbf16, #tpu.memory_space<vmem>>, %arg3: memref<1x128xf32, #tpu.memory_space<vmem>>, %arg4: memref<16x128xf32, #tpu.memory_space<vmem>>) attributes {dimension_semantics = [#tpu.dimension_semantics<parallel>], iteration_bounds = array<i64: 1>, scalar_prefetch = 0 : i64, scratch_operands = 0 : i64, tpu.core_type = #tpu.core_type<tc>, window_params = [{transform_indices = @transform_0, window_bounds = array<i64: 16, 128>}, {pipeline_mode = #tpu.pipeline_mode<synchronous>, transform_indices = @transform_1, window_bounds = array<i64: 128, 128>}, {pipeline_mode = #tpu.pipeline_mode<synchronous>, transform_indices = @transform_2, window_bounds = array<i64: 1, 128>}, {transform_indices = @transform_3, window_bounds = array<i64: 16, 128>}]} {
    %c0 = arith.constant 0 : index
    %c0_0 = arith.constant 0 : index
    %0 = vector.load %arg1[%c0, %c0_0] : memref<16x128xf32, #tpu.memory_space<vmem>>, vector<16x128xf32>
    %1 = arith.truncf %0 : vector<16x128xf32> to vector<16x128xbf16>
    %c0_1 = arith.constant 0 : index
    %c0_2 = arith.constant 0 : index
    %2 = vector.load %arg2[%c0_1, %c0_2] : memref<128x128xbf16, #tpu.memory_space<vmem>>, vector<128x128xbf16>
    %cst = arith.constant dense<0.000000e+00> : vector<16x128xf32>
    %3 = tpu.matmul %1, %2, %cst {dimension_numbers = #tpu.dot_dimension_numbers<[1], [0], [0], [1], [0, 0, 1, 1], [], []>} : vector<16x128xbf16>, vector<128x128xbf16>, vector<16x128xf32> -> vector<16x128xf32>
    %c0_3 = arith.constant 0 : index
    %c0_4 = arith.constant 0 : index
    %4 = vector.load %arg3[%c0_3, %c0_4] : memref<1x128xf32, #tpu.memory_space<vmem>>, vector<1x128xf32>
    %5 = vector.broadcast %4 : vector<1x128xf32> to vector<16x128xf32>
    %6 = arith.addf %3, %5 : vector<16x128xf32>
    %cst_5 = arith.constant 5.000000e-01 : f32
    %7 = vector.broadcast %cst_5 : f32 to vector<16x128xf32>
    %8 = arith.mulf %7, %6 : vector<16x128xf32>
    %9 = arith.mulf %6, %6 : vector<16x128xf32>
    %10 = arith.mulf %6, %9 : vector<16x128xf32>
    %cst_6 = arith.constant 4.471500e-02 : f32
    %11 = vector.broadcast %cst_6 : f32 to vector<16x128xf32>
    %12 = arith.mulf %11, %10 : vector<16x128xf32>
    %13 = arith.addf %6, %12 : vector<16x128xf32>
    %cst_7 = arith.constant 0.797884583 : f32
    %14 = vector.broadcast %cst_7 : f32 to vector<16x128xf32>
    %15 = arith.mulf %14, %13 : vector<16x128xf32>
    %16 = math.tanh %15 : vector<16x128xf32>
    %cst_8 = arith.constant 1.000000e+00 : f32
    %17 = vector.broadcast %cst_8 : f32 to vector<16x128xf32>
    %18 = arith.addf %17, %16 : vector<16x128xf32>
    %19 = arith.mulf %8, %18 : vector<16x128xf32>
    %c0_9 = arith.constant 0 : index
    %c0_10 = arith.constant 0 : index
    %20 = vector.load %arg4[%c0_9, %c0_10] : memref<16x128xf32, #tpu.memory_space<vmem>>, vector<16x128xf32>
    tpu.vector_store %arg4[%c0_9, %c0_10], %19 {strides = array<i32>} : memref<16x128xf32, #tpu.memory_space<vmem>>, vector<16x128xf32>,
    return
  }
  func.func @transform_0(%arg0: i32) -> (i32, i32) {
    %c0_i32 = arith.constant 0 : i32
    %c0_i32_0 = arith.constant 0 : i32
    return %arg0, %c0_i32 : i32, i32
  }
  func.func @transform_1(%arg0: i32) -> (i32, i32) {
    %c0_i32 = arith.constant 0 : i32
    %c0_i32_0 = arith.constant 0 : i32
    %c0_i32_1 = arith.constant 0 : i32
    return %c0_i32, %c0_i32_0 : i32, i32
  }
  func.func @transform_2(%arg0: i32) -> (i32, i32) {
    %c0_i32 = arith.constant 0 : i32
    %c0_i32_0 = arith.constant 0 : i32
    %c0_i32_1 = arith.constant 0 : i32
    return %c0_i32, %c0_i32_0 : i32, i32
  }
  func.func @transform_3(%arg0: i32) -> (i32, i32) {
    %c0_i32 = arith.constant 0 : i32
    %c0_i32_0 = arith.constant 0 : i32
    return %arg0, %c0_i32 : i32, i32
  }
}

</mosaic_0001>

<bundles_post_ra>
// kernel: tpu_custom_call.1
= control target key start
LH: loop header
LB: loop body
LE: loop exit
PB: predicated region body
PF: predicated region fallthrough
CT: control target
= control target key end

     0   :  { %8 = vsyncpa [#allocation3], 0  ;;  %s369_s0 = inlined_call_operand.hbm [shape: f32[16,128], index: 0, kind: input, shape index: {}]   ;;  %s370_s1 = inlined_call_operand.hbm [shape: bf16[128,128], index: 1, kind: input, shape index: {}]   ;;  %s371_s2 = inlined_call_operand.vmem [shape: f32[1,128], index: 2, kind: input, shape index: {}]   ;;  %s372_s3 = inlined_call_operand.hbm [shape: f32[16,128], index: 3, kind: output, shape index: {}]  }
   0x1   :  { %9 = vsyncpa [#allocation6], 0 }
   0x2   :  { %10 = vsyncpa [#allocation4], 0  ;;  %s322_s12 = smov [#allocation2]  }
   0x3   :  { %s16_s13 = sshll.u32 %s322_s12, 4  ;;  %s17_s13 = int_to_ptr.vmem [resolvable:$true] %s16_s13 }
   0x4   :  { %s264_s14 = scalar_lea.vmem %s17_s13, 256  ;;  %p269_p1 = scmp.lt.s32.totalorder %s17_s13, %s17_s13 }
   0x5   :  { %p265_p0 = scmp.ne.s32.totalorder %s17_s13, %s264_s14  ;;  %p270_p2 = scmp.lt.s32.totalorder %s264_s14, %s264_s14 }
   0x7   :  { %p271_p3 = por %p270_p2, %p269_p1 }
   0x9   :  { %p272_p4 = pnand %p271_p3, %p265_p0 }
   0xb   :  { %275 = shalt.err (!%p272_p4)
}
   0xc   :  { %s323_s15 = smov 128   ;;  %s324_s16 = smov 8  }
   0xd   :  { %22 = dma.hbm_to_vmem [thread:$0]  %s369_s0, 256, %s17_s13, [#allocation3], %s323_s15, %s323_s15, %s324_s16  }
   0xe   :  { %s325_s19 = smov [#allocation5]  }
   0xf   :  { %s28_s20 = sshll.u32 %s325_s19, 4  ;;  %s29_s20 = int_to_ptr.vmem [resolvable:$true] %s28_s20 }
  0x10   :  { %s284_s21 = scalar_lea.vmem %s29_s20, 1024  ;;  %p289_p6 = scmp.lt.s32.totalorder %s29_s20, %s29_s20 }
  0x11   :  { %p285_p5 = scmp.ne.s32.totalorder %s29_s20, %s284_s21  ;;  %p290_p7 = scmp.lt.s32.totalorder %s284_s21, %s284_s21 }
  0x13   :  { %p291_p8 = por %p290_p7, %p289_p6 }
  0x15   :  { %p292_p9 = pnand %p291_p8, %p285_p5 }
  0x17   :  { %295 = shalt.err (!%p292_p9)
}
  0x18   :  { %s326_s22 = smov 64   ;;  %s327_s23 = smov 4  }
  0x19   :  { %34 = dma.hbm_to_vmem [thread:$0]  %s370_s1, 1024, %s29_s20, [#allocation6], %s326_s22, %s326_s22, %s327_s23  }
  0x1a   :  { %316 = dma.done.wait [#allocation3], 256  }
  0x1b   :  { %317 = vsyncadd [#allocation3], 4294967040 }
  0x1c   :  { %318 = dma.done.wait [#allocation6], 1024  }
  0x1d   :  { %319 = vsyncadd [#allocation6], 4294966272  ;;  %v328_v0 = vmov 0.0   ;;  %vm329_vm0 = vmmov 0   ;;  %v244_v1 = vld [vmem:[#allocation5 + $0x38] sm:$0xff]   ;;  %v245_v2 = vld [vmem:[#allocation5 + $0x30] sm:$0xff]  }
  0x1e   :  { %215 = vmatprep.subr.bf16.mxu0 %v328_v0  ;;  %231 = vmatprep.mubr.msk.bf16.mxu0 %vm329_vm0, %v328_v0  ;;  %v246_v3 = vld [vmem:[#allocation5 + $0x28] sm:$0xff]   ;;  %v247_v4 = vld [vmem:[#allocation5 + $0x20] sm:$0xff]   ;;  %v248_v5 = vld [vmem:[#allocation5 + $0x18] sm:$0xff]  }
  0x1f   :  { %216 = vmatpush3.bf16.msra.mxu0 %v244_v1  ;;  %v249_v6 = vld [vmem:[#allocation5 + $0x10] sm:$0xff]   ;;  %v250_v7 = vld [vmem:[#allocation5 + $0x8] sm:$0xff]   ;;  %v251_v8 = vld [vmem:[#allocation5] sm:$0xff]  }
  0x20   :  { %217 = vmatprep.subr.bf16.mxu0 %v328_v0  ;;  %v44_v9 = vld [vmem:[#allocation2] sm:$0xff]  ;;  %v45_v10 = vld [vmem:[#allocation2 + $0x8] sm:$0xff] }
  0x21   :  { %v46_v11 = vpack.c.bf16 %v45_v10, %v44_v9  ;;  %v197_v12 = vld [vmem:[%s371_s2] ss:$0 sm:$0xff]  ;;  %s330_s2 = smov [#allocation7]  }
  0x22   :  { %s184_s26 = sshll.u32 %s330_s2, 4  ;;  %s185_s26 = int_to_ptr.vmem [resolvable:$true] %s184_s26 }
  0x23   :  { %218 = vmatpush3.bf16.msra.mxu0 %v245_v2  ;;  %s296_s27 = scalar_lea.vmem %s185_s26, 256  ;;  %p301_p11 = scmp.lt.s32.totalorder %s185_s26, %s185_s26 }
  0x24   :  { %219 = vmatprep.subr.bf16.mxu0 %v328_v0  ;;  %p297_p10 = scmp.ne.s32.totalorder %s185_s26, %s296_s27  ;;  %p302_p12 = scmp.lt.s32.totalorder %s296_s27, %s296_s27 }
  0x26   :  { %p303_p13 = por %p302_p12, %p301_p11 }
  0x27   :  { %220 = vmatpush3.bf16.msra.mxu0 %v246_v3 }
  0x28   :  { %221 = vmatprep.subr.bf16.mxu0 %v328_v0  ;;  %p304_p0 = pnand %p303_p13, %p297_p10 }
  0x2b   :  { %222 = vmatpush3.bf16.msra.mxu0 %v247_v4 }
  0x2c   :  { %223 = vmatprep.subr.bf16.mxu0 %v328_v0 }
  0x2f   :  { %224 = vmatpush3.bf16.msra.mxu0 %v248_v5 }
  0x30   :  { %225 = vmatprep.subr.bf16.mxu0 %v328_v0 }
  0x33   :  { %226 = vmatpush3.bf16.msra.mxu0 %v249_v6 }
  0x34   :  { %227 = vmatprep.subr.bf16.mxu0 %v328_v0 }
  0x37   :  { %228 = vmatpush3.bf16.msra.mxu0 %v250_v7 }
  0x38   :  { %229 = vmatprep.subr.bf16.mxu0 %v328_v0 }
  0x3b   :  { %230 = vmatpush3.bf16.msra.mxu0 %v251_v8 }
  0x3e   :  { %232 = vmatmul.mubr.bf16.vlgmr.msra.gmra.mxu0 %v46_v11 }
  0xfe   :  { %v152_v13 = vpop.f32.mrf.mxu0 }
  0xff   :  { %v153_v14 = vadd.f32 %v197_v12, %v152_v13 }
 0x100   :  { %v233_v15 = vpop.f32.mrf.mxu0 }
 0x101   :  { %v161_v16 = vmul.f32 %v153_v14, %v153_v14  ;;  %v159_v30 = vmul.f32 0.5, %v153_v14 }
 0x102   :  { %v155_v17 = vpop.f32.mrf.mxu0 }
 0x103   :  { %v163_v18 = vmul.f32 %v161_v16, %v153_v14  ;;  %v156_v19 = vadd.f32 %v197_v12, %v155_v17 }
 0x104   :  { %v234_v20 = vpop.f32.mrf.mxu0 }
 0x105   :  { %v165_v21 = vmul.f32 0.044715, %v163_v18  ;;  %v162_v22 = vmul.f32 %v156_v19, %v156_v19  ;;  %v160_v34 = vmul.f32 0.5, %v156_v19 }
 0x107   :  { %v167_v23 = vadd.f32 %v165_v21, %v153_v14  ;;  %v164_v24 = vmul.f32 %v162_v22, %v156_v19 }
 0x109   :  { %v169_v25 = vmul.f32 0.7978846, %v167_v23  ;;  %v166_v26 = vmul.f32 0.044715, %v164_v24 }
 0x10b   :  { %252 = vtanh.f32 %v169_v25  ;;  %v168_v27 = vadd.f32 %v166_v26, %v156_v19 }
 0x10d   :  { %v170_v28 = vmul.f32 0.7978846, %v168_v27 }
 0x10f   :  { %254 = vtanh.f32 %v170_v28 }
 0x118   :  { %v253_v29 = vpop.eup %252 }
 0x119   :  { %v173_v31 = vadd.f32 1.0, %v253_v29 }
 0x11b   :  { %v175_v32 = vmul.f32 %v173_v31, %v159_v30 }
 0x11c   :  { %v255_v33 = vpop.eup %254 }
 0x11d   :  { %v174_v35 = vadd.f32 1.0, %v255_v33  ;;  %177 = vst [vmem:[#allocation7] sm:$0xff] %v175_v32 }
 0x11f   :  { %v176_v36 = vmul.f32 %v174_v35, %v160_v34 }
 0x121   :  { %178 = vst [vmem:[#allocation7 + $0x8] sm:$0xff] %v176_v36 }
 0x122   :  { %307 = shalt.err (!%p304_p0)
}
 0x123   :  { %190 = dma.vmem_to_hbm [thread:$0]  %s185_s26, 256, %s372_s3, [#allocation4], %s323_s15, %s323_s15, %s324_s16  }
 0x124   :  { %320 = dma.done.wait [#allocation4], 256  }
 0x125   :  { %321 = vsyncadd [#allocation4], 4294967040 }
 0x126   :  { %194 = vsyncpa [#allocation3], 1 }
 0x127   :  { %195 = vsyncpa [#allocation6], 1 }
 0x128   :  { %196 = vsyncpa [#allocation4], 1 }

</bundles_post_ra>
